<compile_context>
chip_gen: v7x
topology: tpu7x:2x2x1
jax: 0.10.0
libtpu: 0.0.40
codegen_flags: <defaults>
</compile_context>

<pallas_src>
import functools
import math

import jax
import jax.numpy as jnp
from jax import lax
from jax.experimental import pallas as pl
from jax.experimental.pallas import tpu as pltpu

KH = KW = 3  # kernel_size = (3, 3), padding = (1, 1), stride = 1 (n_dim == 2)


def _round_up(x, m):
    return ((x + m - 1) // m) * m


def _pick_images_per_block(n, m, target_lanes=512):
    """Largest divisor of n with nb*m <= target_lanes (lane-batching factor)."""
    cap = max(1, target_lanes // m)
    nb = 1
    for d in range(1, n + 1):
        if d <= cap and n % d == 0:
            nb = d
    return nb


# ---------------------------------------------------------------------------
# One-time eager probe of pltpu.roll's rotation direction so the kernel's tap
# shifts are guaranteed to match jnp.roll semantics on this jax/libtpu build.
# ---------------------------------------------------------------------------
_ROLL_MATCHES_JNP = None


def _probe_roll_semantics():
    global _ROLL_MATCHES_JNP
    if _ROLL_MATCHES_JNP is None:
        def k(x_ref, o_ref):
            o_ref[...] = pltpu.roll(x_ref[...], 1, axis=1)

        x = jnp.tile(jnp.arange(128, dtype=jnp.float32)[None, :], (8, 1))
        y = pl.pallas_call(
            k, out_shape=jax.ShapeDtypeStruct((8, 128), jnp.float32))(x)
        v = float(jax.device_get(y)[0, 0])
        # jnp.roll(x, 1): out[0] = x[-1] = 127. Opposite convention: out[0] = 1.
        _ROLL_MATCHES_JNP = (v != 1.0)
    return _ROLL_MATCHES_JNP


# ---------------------------------------------------------------------------
# Kernel
# ---------------------------------------------------------------------------
def _unet_conv_fused_kernel(mask_ref, x_ref, w1_ref, b1_ref, w2_ref, b2_ref,
                            o_ref, *, width, roll_matches_jnp):
    """Fused (3x3 conv -> folded-BN bias -> ReLU) x 2 over a block of images.

    mask_ref: (9, L)            per-tap validity (0 where the 3x3 window leaves
                                the image); L = images_per_block * H * W.
    x_ref:    (Cin_p, L)        input, images batched into the lane axis.
    w1_ref:   (Cout_p, 9*Cin_p) conv1 weights with BN1 scale folded in,
                                columns ordered (dy, dx, cin).
    b1_ref:   (Cout_p, 1)       folded BN1 bias (includes conv1 bias).
    w2_ref:   (Cout_p, 9*Cout_p), b2_ref: (Cout_p, 1)
    o_ref:    (Cout_p, L)
    """
    W = width
    lanes = x_ref.shape[-1]

    def tap_shift(src, off):
        # out[:, p] = src[:, (p + off) % lanes]  == jnp.roll(src, -off, axis=1)
        s = (-off) % lanes
        if s == 0:
            return src
        if not roll_matches_jnp:
            s = lanes - s
        return pltpu.roll(src, s, axis=1)

    def im2col(src):
        # Build the (9*C, L) matmul operand entirely in registers: one XLU lane
        # rotation per tap + (boundary taps only) one masked VPU multiply.
        taps = []
        for dy in range(KH):
            for dx in range(KW):
                off = (dy - 1) * W + (dx - 1)
                v = tap_shift(src, off)
                if not (dy == 1 and dx == 1):       # center-tap mask is all-ones
                    t = dy * KW + dx
                    v = v * mask_ref[t:t + 1, :]
                taps.append(v)
        return jnp.concatenate(taps, axis=0)        # (9*C, L)

    def conv_bias_relu(src, w_ref, b_ref):
        # Single MXU matmul per conv: (Cout_p, 9*C) @ (9*C, L), lane-dense out.
        z = jnp.dot(w_ref[...], im2col(src), preferred_element_type=jnp.float32)
        return jnp.maximum(z + b_ref[...], 0.0)

    y1 = conv_bias_relu(x_ref[...], w1_ref, b1_ref)   # never leaves vregs/VMEM
    o_ref[...] = conv_bias_relu(y1, w2_ref, b2_ref).astype(o_ref.dtype)


def _make_tap_masks(H, W):
    """(9, H*W) f32 masks: mask[t, h*W+w] = 1 iff tap t's sample is in-bounds."""
    M = H * W
    hh = jnp.arange(M, dtype=jnp.int32) // W
    ww = jnp.arange(M, dtype=jnp.int32) % W
    rows = []
    for dy in range(KH):
        for dx in range(KW):
            valid = ((hh + (dy - 1) >= 0) & (hh + (dy - 1) < H) &
                     (ww + (dx - 1) >= 0) & (ww + (dx - 1) < W))
            rows.append(valid.astype(jnp.float32))
    return jnp.stack(rows, axis=0)


# ---------------------------------------------------------------------------
# Wrapper
# ---------------------------------------------------------------------------
def unet_conv_pallas(x_nchw, w1_oihw, s1, b1, w2_oihw, s2, b2, *,
                     roll_matches_jnp=True):
    """x: (N,Cin,H,W) f32; w*: (Cout,Cin,3,3) OIHW; s*/b*: (Cout,) folded BN."""
    N, Cin, H, W = x_nchw.shape
    Cout = w1_oihw.shape[0]
    M = H * W

    # Pad channel counts to sublane multiples -> all im2col slabs are aligned.
    Cin_p = _round_up(Cin, 8)
    Cout_p = _round_up(Cout, 8)

    # Layout plumbing only: batch images into the 128-lane axis, (Cin, N*M).
    x_lanes = jnp.transpose(
        x_nchw.reshape(N, Cin, M).astype(jnp.float32), (1, 0, 2)
    ).reshape(Cin, N * M)
    if Cin_p != Cin:
        x_lanes = jnp.pad(x_lanes, ((0, Cin_p - Cin), (0, 0)))

    # Fold BN scale into the (tiny) weight matrices; pad channels with zeros.
    def prep_w(w_oihw, scale, cin_p, cout_p):
        cout, cin = w_oihw.shape[:2]
        w = w_oihw.astype(jnp.float32) * scale.reshape(cout, 1, 1, 1).astype(jnp.float32)
        if cin_p != cin:
            w = jnp.pad(w, ((0, 0), (0, cin_p - cin), (0, 0), (0, 0)))
        if cout_p != cout:
            w = jnp.pad(w, ((0, cout_p - cout), (0, 0), (0, 0), (0, 0)))
        # OIHW -> (Cout_p, 9*Cin_p), columns ordered (dy, dx, cin) = im2col rows.
        return jnp.transpose(w, (0, 2, 3, 1)).reshape(cout_p, KH * KW * cin_p)

    def prep_b(b, cout_p):
        b = b.astype(jnp.float32).reshape(-1, 1)
        if cout_p != b.shape[0]:
            b = jnp.pad(b, ((0, cout_p - b.shape[0]), (0, 0)))
        return b

    w1_mat = prep_w(w1_oihw, s1, Cin_p, Cout_p)
    w2_mat = prep_w(w2_oihw, s2, Cout_p, Cout_p)
    b1c = prep_b(b1, Cout_p)
    b2c = prep_b(b2, Cout_p)

    # Lane-batching: NB images per grid step (512 lanes here -> grid=(1,)).
    NB = _pick_images_per_block(N, M)
    G = N // NB
    masks_blk = jnp.tile(_make_tap_masks(H, W), (1, NB))   # (9, NB*M)

    kernel = functools.partial(_unet_conv_fused_kernel, width=W,
                               roll_matches_jnp=roll_matches_jnp)
    out_lanes = pl.pallas_call(
        kernel,
        out_shape=jax.ShapeDtypeStruct((Cout_p, N * M), jnp.float32),
        grid_spec=pltpu.PrefetchScalarGridSpec(
            num_scalar_prefetch=0,
            grid=(G,),
            in_specs=[
                pl.BlockSpec((KH * KW, NB * M), lambda g: (0, 0)),          # masks
                pl.BlockSpec((Cin_p, NB * M), lambda g: (0, g)),            # x
                pl.BlockSpec((Cout_p, KH * KW * Cin_p), lambda g: (0, 0)),  # w1*s1
                pl.BlockSpec((Cout_p, 1), lambda g: (0, 0)),                # b1
                pl.BlockSpec((Cout_p, KH * KW * Cout_p), lambda g: (0, 0)), # w2*s2
                pl.BlockSpec((Cout_p, 1), lambda g: (0, 0)),                # b2
            ],
            out_specs=pl.BlockSpec((Cout_p, NB * M), lambda g: (0, g)),
        ),
        compiler_params=pltpu.CompilerParams(
            dimension_semantics=("parallel",),
        ),
    )(masks_blk, x_lanes, w1_mat, b1c, w2_mat, b2c)

    out = out_lanes[:Cout].reshape(Cout, N, M)
    return jnp.transpose(out, (1, 0, 2)).reshape(N, Cout, H, W)


_JITTED_FWD = None


def unet_conv_forward(x, w1, s1, b1, w2, s2, b2):
    global _JITTED_FWD
    if _JITTED_FWD is None:
        matches = _probe_roll_semantics()      # eager, one-time, outside jit
        _JITTED_FWD = jax.jit(
            functools.partial(unet_conv_pallas, roll_matches_jnp=matches))
    return _JITTED_FWD(x, w1, s1, b1, w2, s2, b2)


# ---------------------------------------------------------------------------
# Parameters, reference, test
# ---------------------------------------------------------------------------
def _fold_bn(conv_bias, gamma, beta, running_mean, running_var, eps=1e-5):
    """Fold conv bias + eval-mode BatchNorm into per-channel (scale, bias)."""
    scale = gamma / jnp.sqrt(running_var + eps)
    bias = beta + scale * (conv_bias - running_mean)
    return scale, bias


def make_unet_conv_params(key, in_size, out_size):
    """Deterministic parameters matching the PyTorch module's shapes."""
    ks = jax.random.split(key, 4)

    def conv_init(k, cin, cout):
        # PyTorch Conv2d default init: U(-b, b), b = 1/sqrt(cin*kh*kw)
        bound = 1.0 / math.sqrt(cin * KH * KW)
        w = jax.random.uniform(k, (cout, cin, KH, KW), jnp.float32, -bound, bound)
        b = jax.random.uniform(
            jax.random.fold_in(k, 1), (cout,), jnp.float32, -bound, bound)
        return w, b

    def bn_init(k, c):
        gamma = 1.0 + 0.1 * jax.random.normal(k, (c,), jnp.float32)
        beta = 0.1 * jax.random.normal(jax.random.fold_in(k, 1), (c,), jnp.float32)
        mean = 0.1 * jax.random.normal(jax.random.fold_in(k, 2), (c,), jnp.float32)
        var = jnp.abs(1.0 + 0.1 * jax.random.normal(
            jax.random.fold_in(k, 3), (c,), jnp.float32))
        return gamma, beta, mean, var

    w1, cb1 = conv_init(ks[0], in_size, out_size)
    w2, cb2 = conv_init(ks[1], out_size, out_size)
    g1, be1, m1, v1 = bn_init(ks[2], out_size)
    g2, be2, m2, v2 = bn_init(ks[3], out_size)

    s1, b1 = _fold_bn(cb1, g1, be1, m1, v1)
    s2, b2 = _fold_bn(cb2, g2, be2, m2, v2)
    return (w1, s1, b1), (w2, s2, b2)


def _reference_forward(x_nchw, w1, s1, b1, w2, s2, b2):
    """Pure-JAX reference (lax.conv, NCHW) for the correctness check."""
    def block(x, w, s, b):
        y = lax.conv_general_dilated(
            x, w, window_strides=(1, 1), padding=((1, 1), (1, 1)),
            dimension_numbers=("NCHW", "OIHW", "NCHW"))
        y = y * s.reshape(1, -1, 1, 1) + b.reshape(1, -1, 1, 1)
        return jnp.maximum(y, 0.0)

    x = x_nchw.astype(jnp.float32)
    return block(block(x, w1, s1, b1), w2, s2, b2)


if __name__ == "__main__":
    N, Cin, H, W = 2, 4, 16, 16
    Cout = 8

    key = jax.random.PRNGKey(0)
    k_x, k_p = jax.random.split(key)
    x = jax.random.normal(k_x, (N, Cin, H, W), jnp.float32)

    (w1, s1, b1), (w2, s2, b2) = make_unet_conv_params(k_p, Cin, Cout)

    out = unet_conv_forward(x, w1, s1, b1, w2, s2, b2)
    out = jax.block_until_ready(out)

    ref = _reference_forward(x, w1, s1, b1, w2, s2, b2)
    assert out.shape == (N, Cout, H, W)
    assert jnp.allclose(out, ref, atol=1e-4, rtol=1e-4)

    print("KERNEL_OK")
</pallas_src>

<mosaic_0001>
module attributes {stable_mosaic.version = 11 : i64} {
  func.func @k(%arg0: memref<8x128xf32, #tpu.memory_space<vmem>>, %arg1: memref<8x128xf32, #tpu.memory_space<vmem>>) attributes {dimension_semantics = [], scalar_prefetch = 0 : i64, scratch_operands = 0 : i64, tpu.core_type = #tpu.core_type<tc>} {
    %c0 = arith.constant 0 : index
    %c0_0 = arith.constant 0 : index
    %0 = vector.load %arg0[%c0, %c0_0] : memref<8x128xf32, #tpu.memory_space<vmem>>, vector<8x128xf32>
    %c1_i32 = arith.constant 1 : i32
    %1 = tpu.dynamic_rotate %0 by %c1_i32 dim 1 : vector<8x128xf32>, i32 -> vector<8x128xf32>
    %c0_1 = arith.constant 0 : index
    %c0_2 = arith.constant 0 : index
    %2 = vector.load %arg1[%c0_1, %c0_2] : memref<8x128xf32, #tpu.memory_space<vmem>>, vector<8x128xf32>
    tpu.vector_store %arg1[%c0_1, %c0_2], %1 {strides = array<i32>} : memref<8x128xf32, #tpu.memory_space<vmem>>, vector<8x128xf32>,
    return
  }
}

</mosaic_0001>

<bundles_post_ra>
// kernel: tpu_custom_call.1
= control target key start
LH: loop header
LB: loop body
LE: loop exit
PB: predicated region body
PF: predicated region fallthrough
CT: control target
= control target key end

     0   :  { %6 = vsyncpa [#allocation3], 0  ;;  %s128_s0 = inlined_call_operand.hbm [shape: f32[8,128], index: 0, kind: input, shape index: {}]   ;;  %s129_s1 = inlined_call_operand.hbm [shape: f32[8,128], index: 1, kind: output, shape index: {}]  }
   0x1   :  { %7 = vsyncpa [#allocation4], 0  ;;  %s91_s6 = smov [#allocation2]   ;;  %s43_s10 = scalar_lea.hbm %s128_s0, 128 }
   0x2   :  { %s14_s7 = sshll.u32 %s91_s6, 4  ;;  %p44_p0 = scmp.ne.s32.totalorder %s128_s0, %s43_s10  ;;  %s15_s7 = int_to_ptr.vmem [resolvable:$true] %s14_s7 }
   0x3   :  { %p47_p1 = scmp.lt.u32.totalorder %s43_s10, %s128_s0 }
   0x5   :  { %p49_p2 = pnand %p47_p1, %p44_p0 }
   0x7   :  { %52 = shalt.err (!%p49_p2)
}
   0x8   :  { %s53_s15 = scalar_lea.vmem %s15_s7, 128  ;;  %p58_p4 = scmp.lt.s32.totalorder %s15_s7, %s15_s7 }
   0x9   :  { %p54_p3 = scmp.ne.s32.totalorder %s15_s7, %s53_s15  ;;  %p59_p5 = scmp.lt.s32.totalorder %s53_s15, %s53_s15 }
   0xb   :  { %p60_p6 = por %p59_p5, %p58_p4 }
   0xd   :  { %p61_p7 = pnand %p60_p6, %p54_p3 }
   0xf   :  { %64 = shalt.err (!%p61_p7)
}
  0x10   :  { %17 = dma.hbm_to_vmem [thread:$0]  %s128_s0, 128, %s15_s7, [#allocation3]  }
  0x11   :  { %87 = dma.done.wait [#allocation3], 128  }
  0x12   :  { %88 = vsyncadd [#allocation3], 4294967168  ;;  %v21_v0 = vld [vmem:[#allocation2] sm:$0xff]  ;;  %s92_s18 = smov 1   ;;  %s93_s19 = smov [#allocation5]  }
  0x13   :  { %22 = vrot.lane.b32.xlu0 %v21_v0, %s92_s18  ;;  %s31_s20 = sshll.u32 %s93_s19, 4  ;;  %s32_s20 = int_to_ptr.vmem [resolvable:$true] %s31_s20 }
  0x14   :  { %s65_s21 = scalar_lea.vmem %s32_s20, 128  ;;  %p70_p9 = scmp.lt.s32.totalorder %s32_s20, %s32_s20 }
  0x15   :  { %p66_p8 = scmp.ne.s32.totalorder %s32_s20, %s65_s21  ;;  %p71_p10 = scmp.lt.s32.totalorder %s65_s21, %s65_s21 }
  0x17   :  { %p72_p11 = por %p71_p10, %p70_p9 }
  0x19   :  { %p73_p12 = pnand %p72_p11, %p66_p8 }
  0x85   :  { %v23_v1 = vpop.permute.xlu0 %22 }
  0x86   :  { %24 = vst [vmem:[#allocation5] sm:$0xff] %v23_v1 }
  0x87   :  { %76 = shalt.err (!%p73_p12)
}
  0x88   :  { %s77_s0 = scalar_lea.hbm %s129_s1, 128 }
  0x89   :  { %p78_p13 = scmp.ne.s32.totalorder %s129_s1, %s77_s0  ;;  %p81_p0 = scmp.lt.u32.totalorder %s77_s0, %s129_s1 }
  0x8b   :  { %p83_p1 = pnand %p81_p0, %p78_p13 }
  0x8d   :  { %86 = shalt.err (!%p83_p1)
}
  0x8e   :  { %34 = dma.vmem_to_hbm [thread:$0]  %s32_s20, 128, %s129_s1, [#allocation4]  }
  0x8f   :  { %89 = dma.done.wait [#allocation4], 128  }
  0x90   :  { %90 = vsyncadd [#allocation4], 4294967168 }
  0x91   :  { %38 = vsyncpa [#allocation3], 1 }
  0x92   :  { %39 = vsyncpa [#allocation4], 1 }

</bundles_post_ra>
